<compile_context>
chip_gen: v7x
topology: tpu7x:2x2x1
jax: 0.10.0
libtpu: 0.0.40
codegen_flags: <defaults>
</compile_context>

<pallas_src>
import functools

import jax
import jax.numpy as jnp
from jax.experimental import pallas as pl
from jax.experimental.pallas import tpu as pltpu

LANES = 128


def _chip_config():
    """Per-generation (tile_rows, num_shards); conservative fallback."""
    try:
        kind = jax.devices()[0].device_kind.lower()
    except Exception:
        return 4096, 1
    if "v5e" in kind or "v5 lite" in kind or "v5lite" in kind:
        return 4096, 1   # 8 MiB double-buffered fits v5e's 16 MiB scoped default
    if "v7" in kind or "7x" in kind:
        return 8192, 2   # two TensorCores -> one row-shard per core
    return 8192, 1       # v6e and other single-TC chips


def _dice_kernel(pred_ref, target_ref, out_ref, *, n_valid, tile_rows,
                 chunk_rows, tiles_per_shard, total_tiles):
    s = pl.program_id(0)          # shard (maps to a TensorCore on v7x)
    j = pl.program_id(1)          # tile within the shard (reduction axis)

    tile_elems = tile_rows * LANES
    num_chunks = tile_rows // chunk_rows
    g = chunk_rows // 8

    @pl.when(j == 0)
    def _():
        out_ref[...] = jnp.zeros(out_ref.shape, out_ref.dtype)

    # Valid elements remaining in this tile. Interior tiles have
    # n_rem >= tile_elems (fast, unmasked path); only the last real tile and
    # clamped duplicate tiles (n_rem <= 0) take the masked path.
    logical_tile = s * tiles_per_shard + j
    n_rem = n_valid - jnp.minimum(logical_tile, total_tiles) * tile_elems

    def tile_sums(masked):
        def body(i, carry):
            acc_pt, acc_p, acc_t = carry
            r0 = pl.multiple_of(i * chunk_rows, chunk_rows)
            x = pred_ref[pl.ds(r0, chunk_rows), :].astype(jnp.float32)
            t = target_ref[pl.ds(r0, chunk_rows), :].astype(jnp.float32)
            # sigmoid(x) == 0.5*tanh(0.5*x) + 0.5 : single EUP push per element.
            p = 0.5 * jnp.tanh(0.5 * x) + 0.5
            if masked:
                row = jax.lax.broadcasted_iota(jnp.int32, (chunk_rows, LANES), 0)
                col = jax.lax.broadcasted_iota(jnp.int32, (chunk_rows, LANES), 1)
                ok = (r0 + row) * LANES + col < n_rem
                p = jnp.where(ok, p, 0.0)
                t = jnp.where(ok, t, 0.0)
            # (chunk_rows,128) -> (8,128): layout-trivial reshape + VPU adds;
            # the only cross-lane reduction happens once in the wrapper.
            acc_pt = acc_pt + (p * t).reshape(g, 8, LANES).sum(axis=0)
            acc_p = acc_p + p.reshape(g, 8, LANES).sum(axis=0)
            acc_t = acc_t + t.reshape(g, 8, LANES).sum(axis=0)
            return acc_pt, acc_p, acc_t

        zero = jnp.zeros((8, LANES), jnp.float32)
        return jax.lax.fori_loop(0, num_chunks, body, (zero, zero, zero),
                                 unroll=min(4, num_chunks))

    def flush(sums):
        acc_pt, acc_p, acc_t = sums
        out_ref[0, 0, :, :] += acc_pt
        out_ref[0, 1, :, :] += acc_p
        out_ref[0, 2, :, :] += acc_t

    @pl.when(n_rem >= tile_elems)          # all interior tiles: no masking work
    def _():
        flush(tile_sums(masked=False))

    @pl.when(n_rem < tile_elems)           # last real tile / clamped duplicates
    def _():
        flush(tile_sums(masked=True))


def dice_loss(pred, target, smooth=1.0):
    """Pallas TPU implementation of DiceLoss.forward.

    pred:   logits of any shape / float dtype
    target: same total element count (bool / int8 / bf16 / f32 all fine)
    returns: scalar float32 loss
    """
    pred_flat = pred.reshape(-1)
    target_flat = target.reshape(-1)
    n = pred_flat.shape[0]
    assert target_flat.shape[0] == n, "pred/target must have equal element counts"

    smooth = jnp.float32(smooth)

    def _plain_sums(p_part, t_part):
        p = jax.nn.sigmoid(p_part.astype(jnp.float32))
        t = t_part.astype(jnp.float32)
        return jnp.sum(p * t), jnp.sum(p), jnp.sum(t)

    n_main = n - (n % LANES)
    rows = n_main // LANES

    if rows < 8:
        # Tiny input: a kernel launch is not worth it.
        inter, p_sum, t_sum = _plain_sums(pred_flat, target_flat)
        dice = (2.0 * inter + smooth) / (p_sum + t_sum + smooth)
        return jnp.float32(1.0) - dice

    tail_inter = tail_p = tail_t = jnp.float32(0.0)
    if n_main != n:
        # <128-element tail done in plain JAX; padding the inputs instead would
        # force a full read+write copy of both tensors in HBM.
        tail_inter, tail_p, tail_t = _plain_sums(pred_flat[n_main:],
                                                 target_flat[n_main:])
        pred_flat = jax.lax.slice(pred_flat, (0,), (n_main,))
        target_flat = jax.lax.slice(target_flat, (0,), (n_main,))

    # Row-major (rows, 128) views: free reshapes, no data movement.
    pred2d = pred_flat.reshape(rows, LANES)
    target2d = target_flat.reshape(rows, LANES)

    cfg_tile_rows, cfg_shards = _chip_config()
    tile_rows = min(cfg_tile_rows, (rows // 8) * 8)    # multiple of 8, <= rows
    chunk_rows = next(c for c in (32, 16, 8) if c <= tile_rows and tile_rows % c == 0)
    total_tiles = pl.cdiv(rows, tile_rows)
    num_shards = cfg_shards if total_tiles >= cfg_shards else 1
    tiles_per_shard = pl.cdiv(total_tiles, num_shards)

    # Per-tile offset math in the kernel is int32.
    # TODO(synk): inputs over ~2**31 elements would need 64-bit tile offsets.
    assert n_main + tile_rows * LANES < 2 ** 31

    def in_map(s, j):
        # Clamp so the "extra" tiles from the ceil-division re-read the last
        # real tile; their contribution is masked to zero inside the kernel.
        return (jnp.minimum(s * tiles_per_shard + j, total_tiles - 1), 0)

    if num_shards > 1:
        # Guarantee one shard per TensorCore on v7x.
        dim_sems = (pltpu.CORE_PARALLEL, pltpu.ARBITRARY)
    else:
        dim_sems = ("arbitrary", "arbitrary")

    bytes_accessed = (pred2d.size * pred2d.dtype.itemsize
                      + target2d.size * target2d.dtype.itemsize
                      + num_shards * 3 * 8 * LANES * 4)
    cost = pl.CostEstimate(flops=7 * n_main, transcendentals=n_main,
                           bytes_accessed=bytes_accessed)

    partials = pl.pallas_call(
        functools.partial(_dice_kernel, n_valid=n_main, tile_rows=tile_rows,
                          chunk_rows=chunk_rows, tiles_per_shard=tiles_per_shard,
                          total_tiles=total_tiles),
        out_shape=jax.ShapeDtypeStruct((num_shards, 3, 8, LANES), jnp.float32),
        grid_spec=pltpu.PrefetchScalarGridSpec(
            num_scalar_prefetch=0,
            grid=(num_shards, tiles_per_shard),
            in_specs=[pl.BlockSpec((tile_rows, LANES), in_map),
                      pl.BlockSpec((tile_rows, LANES), in_map)],
            out_specs=pl.BlockSpec((1, 3, 8, LANES), lambda s, j: (s, 0, 0, 0)),
        ),
        compiler_params=pltpu.CompilerParams(
            dimension_semantics=dim_sems,
            vmem_limit_bytes=32 * 1024 * 1024),
        cost_estimate=cost,
    )(pred2d, target2d)

    # Single tiny cross-lane reduction + dice formula (num_shards*3*8*128 f32).
    sums = jnp.sum(partials, axis=(0, 2, 3))
    inter = sums[0] + tail_inter
    p_sum = sums[1] + tail_p
    t_sum = sums[2] + tail_t
    dice = (2.0 * inter + smooth) / (p_sum + t_sum + smooth)
    return jnp.float32(1.0) - dice


def dice_loss_ref(pred, target, smooth=1.0):
    p = jax.nn.sigmoid(pred.astype(jnp.float32)).reshape(-1)
    t = target.astype(jnp.float32).reshape(-1)
    inter = jnp.sum(p * t)
    dice = (2.0 * inter + smooth) / (jnp.sum(p) + jnp.sum(t) + smooth)
    return 1.0 - dice


if __name__ == "__main__":
    key = jax.random.PRNGKey(0)
    k1, k2, k3, k4 = jax.random.split(key, 4)

    # [B, C, H, W] logits + binary masks. Element count is a multiple of 128:
    # copy-free fast path, fully unmasked tiles.
    B, C, H, W = 2, 4, 16, 16
    pred = jax.random.normal(k1, (B, C, H, W), dtype=jnp.float32)
    target = (jax.random.uniform(k2, (B, C, H, W)) > 0.5).astype(jnp.float32)
    loss = dice_loss(pred, target, smooth=1.0)
    jax.block_until_ready(loss)
    ref = dice_loss_ref(pred, target, smooth=1.0)
    assert jnp.allclose(loss, ref, atol=1e-5, rtol=1e-5), (loss, ref)

    # Unaligned element count (2*3*17*19 = 1938): exercises the ragged masked
    # last tile and the <128-element pure-JAX tail.
    pred2 = jax.random.normal(k3, (2, 3, 17, 19), dtype=jnp.float32)
    target2 = (jax.random.uniform(k4, (2, 3, 17, 19)) > 0.5).astype(jnp.float32)
    loss2 = dice_loss(pred2, target2, smooth=1.0)
    jax.block_until_ready(loss2)
    ref2 = dice_loss_ref(pred2, target2, smooth=1.0)
    assert jnp.allclose(loss2, ref2, atol=1e-5, rtol=1e-5), (loss2, ref2)

    print("KERNEL_OK")
</pallas_src>

<mosaic_0001>
module attributes {stable_mosaic.version = 11 : i64} {
  func.func @_dice_kernel(%arg0: i32, %arg1: i32, %arg2: memref<16x128xf32, #tpu.memory_space<vmem>>, %arg3: memref<16x128xf32, #tpu.memory_space<vmem>>, %arg4: memref<1x3x8x128xf32, #tpu.memory_space<vmem>>) attributes {dimension_semantics = [#tpu.dimension_semantics<arbitrary>, #tpu.dimension_semantics<arbitrary>], iteration_bounds = array<i64: 1, 1>, scalar_prefetch = 0 : i64, scratch_operands = 0 : i64, tpu.core_type = #tpu.core_type<tc>, window_params = [{transform_indices = @transform_0, window_bounds = array<i64: 16, 128>}, {transform_indices = @transform_1, window_bounds = array<i64: 16, 128>}, {transform_indices = @transform_2, window_bounds = array<i64: 1, 3, 8, 128>}]} {
    %c0_i32 = arith.constant 0 : i32
    %0 = arith.cmpi eq, %arg1, %c0_i32 : i32
    %1 = arith.extui %0 : i1 to i32
    %c0_i32_0 = arith.constant 0 : i32
    %2 = arith.cmpi ne, %1, %c0_i32_0 : i32
    scf.if %2 {
      %cst = arith.constant 0.000000e+00 : f32
      %14 = vector.broadcast %cst : f32 to vector<1x3x8x128xf32>
      %c0 = arith.constant 0 : index
      %c0_7 = arith.constant 0 : index
      %c0_8 = arith.constant 0 : index
      %c0_9 = arith.constant 0 : index
      %15 = vector.load %arg4[%c0, %c0_7, %c0_8, %c0_9] : memref<1x3x8x128xf32, #tpu.memory_space<vmem>>, vector<1x3x8x128xf32>
      tpu.vector_store %arg4[%c0, %c0_7, %c0_8, %c0_9], %14 {strides = array<i32>} : memref<1x3x8x128xf32, #tpu.memory_space<vmem>>, vector<1x3x8x128xf32>,
    } else {
    }
    %c1_i32 = arith.constant 1 : i32
    %3 = arith.muli %arg0, %c1_i32 : i32
    %4 = arith.addi %3, %arg1 : i32
    %c1_i32_1 = arith.constant 1 : i32
    %5 = arith.minsi %4, %c1_i32_1 : i32
    %c2048_i32 = arith.constant 2048 : i32
    %6 = arith.muli %5, %c2048_i32 : i32
    %c2048_i32_2 = arith.constant 2048 : i32
    %7 = arith.subi %c2048_i32_2, %6 : i32
    %c2048_i32_3 = arith.constant 2048 : i32
    %8 = arith.cmpi sge, %7, %c2048_i32_3 : i32
    %9 = arith.extui %8 : i1 to i32
    %c0_i32_4 = arith.constant 0 : i32
    %10 = arith.cmpi ne, %9, %c0_i32_4 : i32
    scf.if %10 {
      %cst = arith.constant 0.000000e+00 : f32
      %14 = vector.broadcast %cst : f32 to vector<8x128xf32>
      %c0_i32_7 = arith.constant 0 : i32
      %c16_i32 = arith.constant 16 : i32
      %15 = arith.muli %c0_i32_7, %c16_i32 : i32
      %16 = tpu.assume_multiple %15, 16 : i32
      %17 = arith.index_cast %16 : i32 to index
      %c0 = arith.constant 0 : index
      %18 = vector.load %arg2[%17, %c0] : memref<16x128xf32, #tpu.memory_space<vmem>>, vector<16x128xf32>
      %19 = arith.index_cast %16 : i32 to index
      %c0_8 = arith.constant 0 : index
      %20 = vector.load %arg3[%19, %c0_8] : memref<16x128xf32, #tpu.memory_space<vmem>>, vector<16x128xf32>
      %cst_9 = arith.constant 5.000000e-01 : f32
      %21 = vector.broadcast %cst_9 : f32 to vector<16x128xf32>
      %22 = arith.mulf %21, %18 : vector<16x128xf32>
      %23 = math.tanh %22 : vector<16x128xf32>
      %cst_10 = arith.constant 5.000000e-01 : f32
      %24 = vector.broadcast %cst_10 : f32 to vector<16x128xf32>
      %25 = arith.mulf %24, %23 : vector<16x128xf32>
      %cst_11 = arith.constant 5.000000e-01 : f32
      %26 = vector.broadcast %cst_11 : f32 to vector<16x128xf32>
      %27 = arith.addf %25, %26 : vector<16x128xf32>
      %28 = arith.mulf %27, %20 : vector<16x128xf32>
      %29 = vector.shape_cast %28 : vector<16x128xf32> to vector<2x8x128xf32>
      %cst_12 = arith.constant dense<0.000000e+00> : vector<8x128xf32>
      %30 = vector.multi_reduction <add>, %29, %cst_12 [0] : vector<2x8x128xf32> to vector<8x128xf32>
      %31 = arith.addf %14, %30 : vector<8x128xf32>
      %32 = vector.shape_cast %27 : vector<16x128xf32> to vector<2x8x128xf32>
      %cst_13 = arith.constant dense<0.000000e+00> : vector<8x128xf32>
      %33 = vector.multi_reduction <add>, %32, %cst_13 [0] : vector<2x8x128xf32> to vector<8x128xf32>
      %34 = arith.addf %14, %33 : vector<8x128xf32>
      %35 = vector.shape_cast %20 : vector<16x128xf32> to vector<2x8x128xf32>
      %cst_14 = arith.constant dense<0.000000e+00> : vector<8x128xf32>
      %36 = vector.multi_reduction <add>, %35, %cst_14 [0] : vector<2x8x128xf32> to vector<8x128xf32>
      %37 = arith.addf %14, %36 : vector<8x128xf32>
      %c1_i32_15 = arith.constant 1 : i32
      %c0_16 = arith.constant 0 : index
      %c0_17 = arith.constant 0 : index
      %c0_18 = arith.constant 0 : index
      %c0_19 = arith.constant 0 : index
      %38 = vector.load %arg4[%c0_16, %c0_17, %c0_18, %c0_19] : memref<1x3x8x128xf32, #tpu.memory_space<vmem>>, vector<1x1x8x128xf32>
      %39 = vector.shape_cast %38 : vector<1x1x8x128xf32> to vector<8x128xf32>
      %40 = arith.addf %39, %31 : vector<8x128xf32>
      %c0_20 = arith.constant 0 : index
      %c0_21 = arith.constant 0 : index
      %c0_22 = arith.constant 0 : index
      %c0_23 = arith.constant 0 : index
      %41 = vector.load %arg4[%c0_20, %c0_21, %c0_22, %c0_23] : memref<1x3x8x128xf32, #tpu.memory_space<vmem>>, vector<1x1x8x128xf32>
      %42 = vector.shape_cast %41 : vector<1x1x8x128xf32> to vector<8x128xf32>
      %43 = vector.shape_cast %40 : vector<8x128xf32> to vector<1x1x8x128xf32>
      tpu.vector_store %arg4[%c0_20, %c0_21, %c0_22, %c0_23], %43 {strides = array<i32>} : memref<1x3x8x128xf32, #tpu.memory_space<vmem>>, vector<1x1x8x128xf32>,
      %c0_24 = arith.constant 0 : index
      %c1 = arith.constant 1 : index
      %c0_25 = arith.constant 0 : index
      %c0_26 = arith.constant 0 : index
      %44 = vector.load %arg4[%c0_24, %c1, %c0_25, %c0_26] : memref<1x3x8x128xf32, #tpu.memory_space<vmem>>, vector<1x1x8x128xf32>
      %45 = vector.shape_cast %44 : vector<1x1x8x128xf32> to vector<8x128xf32>
      %46 = arith.addf %45, %34 : vector<8x128xf32>
      %c0_27 = arith.constant 0 : index
      %c1_28 = arith.constant 1 : index
      %c0_29 = arith.constant 0 : index
      %c0_30 = arith.constant 0 : index
      %47 = vector.load %arg4[%c0_27, %c1_28, %c0_29, %c0_30] : memref<1x3x8x128xf32, #tpu.memory_space<vmem>>, vector<1x1x8x128xf32>
      %48 = vector.shape_cast %47 : vector<1x1x8x128xf32> to vector<8x128xf32>
      %49 = vector.shape_cast %46 : vector<8x128xf32> to vector<1x1x8x128xf32>
      tpu.vector_store %arg4[%c0_27, %c1_28, %c0_29, %c0_30], %49 {strides = array<i32>} : memref<1x3x8x128xf32, #tpu.memory_space<vmem>>, vector<1x1x8x128xf32>,
      %c0_31 = arith.constant 0 : index
      %c2 = arith.constant 2 : index
      %c0_32 = arith.constant 0 : index
      %c0_33 = arith.constant 0 : index
      %50 = vector.load %arg4[%c0_31, %c2, %c0_32, %c0_33] : memref<1x3x8x128xf32, #tpu.memory_space<vmem>>, vector<1x1x8x128xf32>
      %51 = vector.shape_cast %50 : vector<1x1x8x128xf32> to vector<8x128xf32>
      %52 = arith.addf %51, %37 : vector<8x128xf32>
      %c0_34 = arith.constant 0 : index
      %c2_35 = arith.constant 2 : index
      %c0_36 = arith.constant 0 : index
      %c0_37 = arith.constant 0 : index
      %53 = vector.load %arg4[%c0_34, %c2_35, %c0_36, %c0_37] : memref<1x3x8x128xf32, #tpu.memory_space<vmem>>, vector<1x1x8x128xf32>
      %54 = vector.shape_cast %53 : vector<1x1x8x128xf32> to vector<8x128xf32>
      %55 = vector.shape_cast %52 : vector<8x128xf32> to vector<1x1x8x128xf32>
      tpu.vector_store %arg4[%c0_34, %c2_35, %c0_36, %c0_37], %55 {strides = array<i32>} : memref<1x3x8x128xf32, #tpu.memory_space<vmem>>, vector<1x1x8x128xf32>,
    } else {
    }
    %c2048_i32_5 = arith.constant 2048 : i32
    %11 = arith.cmpi slt, %7, %c2048_i32_5 : i32
    %12 = arith.extui %11 : i1 to i32
    %c0_i32_6 = arith.constant 0 : i32
    %13 = arith.cmpi ne, %12, %c0_i32_6 : i32
    scf.if %13 {
      %cst = arith.constant 0.000000e+00 : f32
      %14 = vector.broadcast %cst : f32 to vector<8x128xf32>
      %c0_i32_7 = arith.constant 0 : i32
      %c16_i32 = arith.constant 16 : i32
      %15 = arith.muli %c0_i32_7, %c16_i32 : i32
      %16 = tpu.assume_multiple %15, 16 : i32
      %17 = arith.index_cast %16 : i32 to index
      %c0 = arith.constant 0 : index
      %18 = vector.load %arg2[%17, %c0] : memref<16x128xf32, #tpu.memory_space<vmem>>, vector<16x128xf32>
      %19 = arith.index_cast %16 : i32 to index
      %c0_8 = arith.constant 0 : index
      %20 = vector.load %arg3[%19, %c0_8] : memref<16x128xf32, #tpu.memory_space<vmem>>, vector<16x128xf32>
      %cst_9 = arith.constant 5.000000e-01 : f32
      %21 = vector.broadcast %cst_9 : f32 to vector<16x128xf32>
      %22 = arith.mulf %21, %18 : vector<16x128xf32>
      %23 = math.tanh %22 : vector<16x128xf32>
      %cst_10 = arith.constant 5.000000e-01 : f32
      %24 = vector.broadcast %cst_10 : f32 to vector<16x128xf32>
      %25 = arith.mulf %24, %23 : vector<16x128xf32>
      %cst_11 = arith.constant 5.000000e-01 : f32
      %26 = vector.broadcast %cst_11 : f32 to vector<16x128xf32>
      %27 = arith.addf %25, %26 : vector<16x128xf32>
      %28 = tpu.iota {dimensions = array<i32: 0>} : vector<16x128xi32>
      %29 = tpu.iota {dimensions = array<i32: 1>} : vector<16x128xi32>
      %30 = vector.broadcast %16 : i32 to vector<16x128xi32>
      %31 = arith.addi %30, %28 : vector<16x128xi32>
      %c128_i32 = arith.constant 128 : i32
      %32 = vector.broadcast %c128_i32 : i32 to vector<16x128xi32>
      %33 = arith.muli %31, %32 : vector<16x128xi32>
      %34 = arith.addi %33, %29 : vector<16x128xi32>
      %35 = vector.broadcast %7 : i32 to vector<16x128xi32>
      %36 = arith.cmpi slt, %34, %35 : vector<16x128xi32>
      %cst_12 = arith.constant 0.000000e+00 : f32
      %37 = vector.broadcast %cst_12 : f32 to vector<16x128xf32>
      %38 = arith.select %36, %27, %37 : vector<16x128xi1>, vector<16x128xf32>
      %cst_13 = arith.constant 0.000000e+00 : f32
      %39 = vector.broadcast %cst_13 : f32 to vector<16x128xf32>
      %40 = arith.select %36, %20, %39 : vector<16x128xi1>, vector<16x128xf32>
      %41 = arith.mulf %38, %40 : vector<16x128xf32>
      %42 = vector.shape_cast %41 : vector<16x128xf32> to vector<2x8x128xf32>
      %cst_14 = arith.constant dense<0.000000e+00> : vector<8x128xf32>
      %43 = vector.multi_reduction <add>, %42, %cst_14 [0] : vector<2x8x128xf32> to vector<8x128xf32>
      %44 = arith.addf %14, %43 : vector<8x128xf32>
      %45 = vector.shape_cast %38 : vector<16x128xf32> to vector<2x8x128xf32>
      %cst_15 = arith.constant dense<0.000000e+00> : vector<8x128xf32>
      %46 = vector.multi_reduction <add>, %45, %cst_15 [0] : vector<2x8x128xf32> to vector<8x128xf32>
      %47 = arith.addf %14, %46 : vector<8x128xf32>
      %48 = vector.shape_cast %40 : vector<16x128xf32> to vector<2x8x128xf32>
      %cst_16 = arith.constant dense<0.000000e+00> : vector<8x128xf32>
      %49 = vector.multi_reduction <add>, %48, %cst_16 [0] : vector<2x8x128xf32> to vector<8x128xf32>
      %50 = arith.addf %14, %49 : vector<8x128xf32>
      %c1_i32_17 = arith.constant 1 : i32
      %c0_18 = arith.constant 0 : index
      %c0_19 = arith.constant 0 : index
      %c0_20 = arith.constant 0 : index
      %c0_21 = arith.constant 0 : index
      %51 = vector.load %arg4[%c0_18, %c0_19, %c0_20, %c0_21] : memref<1x3x8x128xf32, #tpu.memory_space<vmem>>, vector<1x1x8x128xf32>
      %52 = vector.shape_cast %51 : vector<1x1x8x128xf32> to vector<8x128xf32>
      %53 = arith.addf %52, %44 : vector<8x128xf32>
      %c0_22 = arith.constant 0 : index
      %c0_23 = arith.constant 0 : index
      %c0_24 = arith.constant 0 : index
      %c0_25 = arith.constant 0 : index
      %54 = vector.load %arg4[%c0_22, %c0_23, %c0_24, %c0_25] : memref<1x3x8x128xf32, #tpu.memory_space<vmem>>, vector<1x1x8x128xf32>
      %55 = vector.shape_cast %54 : vector<1x1x8x128xf32> to vector<8x128xf32>
      %56 = vector.shape_cast %53 : vector<8x128xf32> to vector<1x1x8x128xf32>
      tpu.vector_store %arg4[%c0_22, %c0_23, %c0_24, %c0_25], %56 {strides = array<i32>} : memref<1x3x8x128xf32, #tpu.memory_space<vmem>>, vector<1x1x8x128xf32>,
      %c0_26 = arith.constant 0 : index
      %c1 = arith.constant 1 : index
      %c0_27 = arith.constant 0 : index
      %c0_28 = arith.constant 0 : index
      %57 = vector.load %arg4[%c0_26, %c1, %c0_27, %c0_28] : memref<1x3x8x128xf32, #tpu.memory_space<vmem>>, vector<1x1x8x128xf32>
      %58 = vector.shape_cast %57 : vector<1x1x8x128xf32> to vector<8x128xf32>
      %59 = arith.addf %58, %47 : vector<8x128xf32>
      %c0_29 = arith.constant 0 : index
      %c1_30 = arith.constant 1 : index
      %c0_31 = arith.constant 0 : index
      %c0_32 = arith.constant 0 : index
      %60 = vector.load %arg4[%c0_29, %c1_30, %c0_31, %c0_32] : memref<1x3x8x128xf32, #tpu.memory_space<vmem>>, vector<1x1x8x128xf32>
      %61 = vector.shape_cast %60 : vector<1x1x8x128xf32> to vector<8x128xf32>
      %62 = vector.shape_cast %59 : vector<8x128xf32> to vector<1x1x8x128xf32>
      tpu.vector_store %arg4[%c0_29, %c1_30, %c0_31, %c0_32], %62 {strides = array<i32>} : memref<1x3x8x128xf32, #tpu.memory_space<vmem>>, vector<1x1x8x128xf32>,
      %c0_33 = arith.constant 0 : index
      %c2 = arith.constant 2 : index
      %c0_34 = arith.constant 0 : index
      %c0_35 = arith.constant 0 : index
      %63 = vector.load %arg4[%c0_33, %c2, %c0_34, %c0_35] : memref<1x3x8x128xf32, #tpu.memory_space<vmem>>, vector<1x1x8x128xf32>
      %64 = vector.shape_cast %63 : vector<1x1x8x128xf32> to vector<8x128xf32>
      %65 = arith.addf %64, %50 : vector<8x128xf32>
      %c0_36 = arith.constant 0 : index
      %c2_37 = arith.constant 2 : index
      %c0_38 = arith.constant 0 : index
      %c0_39 = arith.constant 0 : index
      %66 = vector.load %arg4[%c0_36, %c2_37, %c0_38, %c0_39] : memref<1x3x8x128xf32, #tpu.memory_space<vmem>>, vector<1x1x8x128xf32>
      %67 = vector.shape_cast %66 : vector<1x1x8x128xf32> to vector<8x128xf32>
      %68 = vector.shape_cast %65 : vector<8x128xf32> to vector<1x1x8x128xf32>
      tpu.vector_store %arg4[%c0_36, %c2_37, %c0_38, %c0_39], %68 {strides = array<i32>} : memref<1x3x8x128xf32, #tpu.memory_space<vmem>>, vector<1x1x8x128xf32>,
    } else {
    }
    return
  }
  func.func @transform_0(%arg0: i32, %arg1: i32) -> (i32, i32) {
    %c1_i32 = arith.constant 1 : i32
    %0 = arith.muli %arg0, %c1_i32 : i32
    %1 = arith.addi %0, %arg1 : i32
    %c0_i32 = arith.constant 0 : i32
    %2 = arith.minsi %1, %c0_i32 : i32
    %c0_i32_0 = arith.constant 0 : i32
    %c0_i32_1 = arith.constant 0 : i32
    return %2, %c0_i32_0 : i32, i32
  }
  func.func @transform_1(%arg0: i32, %arg1: i32) -> (i32, i32) {
    %c1_i32 = arith.constant 1 : i32
    %0 = arith.muli %arg0, %c1_i32 : i32
    %1 = arith.addi %0, %arg1 : i32
    %c0_i32 = arith.constant 0 : i32
    %2 = arith.minsi %1, %c0_i32 : i32
    %c0_i32_0 = arith.constant 0 : i32
    %c0_i32_1 = arith.constant 0 : i32
    return %2, %c0_i32_0 : i32, i32
  }
  func.func @transform_2(%arg0: i32, %arg1: i32) -> (i32, i32, i32, i32) {
    %c0_i32 = arith.constant 0 : i32
    %c0_i32_0 = arith.constant 0 : i32
    %c0_i32_1 = arith.constant 0 : i32
    %c0_i32_2 = arith.constant 0 : i32
    return %arg0, %c0_i32, %c0_i32_0, %c0_i32_1 : i32, i32, i32, i32
  }
}

</mosaic_0001>

<bundles_post_ra>
// kernel: tpu_custom_call.1
= control target key start
LH: loop header
LB: loop body
LE: loop exit
PB: predicated region body
PF: predicated region fallthrough
CT: control target
= control target key end

     0   :  { %7 = vsyncpa [#allocation3], 0  ;;  %s330_s0 = inlined_call_operand.hbm [shape: f32[16,128], index: 0, kind: input, shape index: {}]   ;;  %s331_s1 = inlined_call_operand.hbm [shape: f32[16,128], index: 1, kind: input, shape index: {}]   ;;  %s332_s2 = inlined_call_operand.hbm [shape: f32[1,3,8,128], index: 2, kind: output, shape index: {}]  }
   0x1   :  { %8 = vsyncpa [#allocation6], 0 }
   0x2   :  { %9 = vsyncpa [#allocation4], 0  ;;  %s265_s9 = smov [#allocation2]   ;;  %s193_s13 = scalar_lea.hbm %s330_s0, 256 }
   0x3   :  { %s21_s10 = sshll.u32 %s265_s9, 4  ;;  %p194_p0 = scmp.ne.s32.totalorder %s330_s0, %s193_s13  ;;  %s22_s10 = int_to_ptr.vmem [resolvable:$true] %s21_s10 }
   0x4   :  { %p197_p1 = scmp.lt.u32.totalorder %s193_s13, %s330_s0 }
   0x6   :  { %p199_p2 = pnand %p197_p1, %p194_p0 }
   0x8   :  { %202 = shalt.err (!%p199_p2)
}
   0x9   :  { %s203_s18 = scalar_lea.vmem %s22_s10, 256  ;;  %p208_p4 = scmp.lt.s32.totalorder %s22_s10, %s22_s10 }
   0xa   :  { %p204_p3 = scmp.ne.s32.totalorder %s22_s10, %s203_s18  ;;  %p209_p5 = scmp.lt.s32.totalorder %s203_s18, %s203_s18 }
   0xc   :  { %p210_p6 = por %p209_p5, %p208_p4 }
   0xe   :  { %p211_p7 = pnand %p210_p6, %p204_p3 }
  0x10   :  { %214 = shalt.err (!%p211_p7)
}
  0x11   :  { %s266_s19 = smov 128   ;;  %s267_s20 = smov 8  }
  0x12   :  { %27 = dma.hbm_to_vmem [thread:$0]  %s330_s0, 256, %s22_s10, [#allocation3], %s266_s19, %s266_s19, %s267_s20  }
  0x13   :  { %s268_s23 = smov [#allocation5]   ;;  %s215_s27 = scalar_lea.hbm %s331_s1, 256 }
  0x14   :  { %s39_s24 = sshll.u32 %s268_s23, 4  ;;  %p216_p8 = scmp.ne.s32.totalorder %s331_s1, %s215_s27  ;;  %s40_s24 = int_to_ptr.vmem [resolvable:$true] %s39_s24 }
  0x15   :  { %p219_p9 = scmp.lt.u32.totalorder %s215_s27, %s331_s1 }
  0x17   :  { %p221_p10 = pnand %p219_p9, %p216_p8 }
  0x19   :  { %224 = shalt.err (!%p221_p10)
}
  0x1a   :  { %s225_s4 = scalar_lea.vmem %s40_s24, 256  ;;  %p230_p12 = scmp.lt.s32.totalorder %s40_s24, %s40_s24 }
  0x1b   :  { %p226_p11 = scmp.ne.s32.totalorder %s40_s24, %s225_s4  ;;  %p231_p13 = scmp.lt.s32.totalorder %s225_s4, %s225_s4 }
  0x1d   :  { %p232_p0 = por %p231_p13, %p230_p12 }
  0x1f   :  { %p233_p1 = pnand %p232_p0, %p226_p11 }
  0x21   :  { %236 = shalt.err (!%p233_p1)
}
  0x22   :  { %45 = dma.hbm_to_vmem [thread:$0]  %s331_s1, 256, %s40_s24, [#allocation6], %s266_s19, %s266_s19, %s267_s20  }
  0x23   :  { %259 = dma.done.wait [#allocation3], 256  }
  0x24   :  { %260 = vsyncadd [#allocation3], 4294967040 }
  0x25   :  { %261 = dma.done.wait [#allocation6], 256  }
  0x26   :  { %262 = vsyncadd [#allocation6], 4294967040  ;;  %v76_v0 = vld [vmem:[#allocation2] sm:$0xff]  ;;  %v77_v1 = vld [vmem:[#allocation2 + $0x8] sm:$0xff]  ;;  %s269_s1 = smov [#allocation7]  }
  0x27   :  { %v78_v2 = vld [vmem:[#allocation5] sm:$0xff]  ;;  %v79_v3 = vld [vmem:[#allocation5 + $0x8] sm:$0xff]  ;;  %v80_v4 = vmul.f32 0.5, %v76_v0  ;;  %v81_v5 = vmul.f32 0.5, %v77_v1  ;;  %s166_s6 = sshll.u32 %s269_s1, 4  ;;  %s167_s6 = int_to_ptr.vmem [resolvable:$true] %s166_s6 }
  0x28   :  { %v94_v6 = vadd.f32 %v79_v3, %v78_v2  ;;  %s237_s7 = scalar_lea.vmem %s167_s6, 384  ;;  %p242_p3 = scmp.lt.s32.totalorder %s167_s6, %s167_s6 }
  0x29   :  { %189 = vtanh.f32 %v80_v4  ;;  %p238_p2 = scmp.ne.s32.totalorder %s167_s6, %s237_s7  ;;  %p243_p4 = scmp.lt.s32.totalorder %s237_s7, %s237_s7 }
  0x2a   :  { %191 = vtanh.f32 %v81_v5  ;;  %106 = vst [vmem:[#allocation7 + $0x10] sm:$0xff] %v94_v6 }
  0x2b   :  { %p244_p5 = por %p243_p4, %p242_p3 }
  0x2d   :  { %p245_p6 = pnand %p244_p5, %p238_p2 }
  0x33   :  { %v190_v7 = vpop.eup %189 }
  0x34   :  { %v192_v8 = vpop.eup %191  ;;  %v84_v9 = vmul.f32 0.5, %v190_v7 }
  0x35   :  { %v85_v10 = vmul.f32 0.5, %v192_v8 }
  0x36   :  { %v86_v11 = vadd.f32 0.5, %v84_v9 }
  0x37   :  { %v87_v12 = vadd.f32 0.5, %v85_v10 }
  0x38   :  { %v88_v13 = vmul.f32 %v86_v11, %v78_v2 }
  0x39   :  { %v89_v14 = vmul.f32 %v87_v12, %v79_v3  ;;  %v92_v15 = vadd.f32 %v87_v12, %v86_v11 }
  0x3b   :  { %v90_v16 = vadd.f32 %v89_v14, %v88_v13  ;;  %102 = vst [vmem:[#allocation7 + $0x8] sm:$0xff] %v92_v15 }
  0x3d   :  { %98 = vst [vmem:[#allocation7] sm:$0xff] %v90_v16 }
  0x3e   :  { %248 = shalt.err (!%p245_p6)
}
  0x3f   :  { %s249_s10 = scalar_lea.hbm %s332_s2, 384 }
  0x40   :  { %p250_p7 = scmp.ne.s32.totalorder %s332_s2, %s249_s10  ;;  %p253_p8 = scmp.lt.u32.totalorder %s249_s10, %s332_s2 }
  0x42   :  { %p255_p9 = pnand %p253_p8, %p250_p7 }
  0x44   :  { %258 = shalt.err (!%p255_p9)
}
  0x45   :  { %172 = dma.vmem_to_hbm [thread:$0]  %s167_s6, 384, %s332_s2, [#allocation4], %s266_s19, %s266_s19, %s267_s20  }
  0x46   :  { %263 = dma.done.wait [#allocation4], 384  }
  0x47   :  { %264 = vsyncadd [#allocation4], 4294966912 }
  0x48   :  { %176 = vsyncpa [#allocation3], 1 }
  0x49   :  { %177 = vsyncpa [#allocation6], 1 }
  0x4a   :  { %178 = vsyncpa [#allocation4], 1 }

</bundles_post_ra>
